<compile_context>
chip_gen: v7x
topology: tpu7x:2x2x1
jax: 0.10.0
libtpu: 0.0.40
codegen_flags: <defaults>
</compile_context>

<pallas_src>
import jax
import jax.numpy as jnp
from jax.experimental import pallas as pl
from jax.experimental.pallas import tpu as pltpu


def _round_up(n, m):
    return ((n + m - 1) // m) * m


def mlp_kernel(x_ref, w1_ref, b1_ref, w2_ref, b2_ref, w3t_ref, b3_ref, o_ref):
    x = x_ref[...]                                        # (T, 3) f32

    # ---- Layer 1: Linear(3, 100) -- K=3 is far below MXU tile size; do it as
    # three broadcast multiply-adds on the VPU (keeps the MXU slot free).
    w1 = w1_ref[...]                                      # (3, 100)
    h1 = (x[:, 0:1] * w1[0:1, :]
          + x[:, 1:2] * w1[1:2, :]
          + x[:, 2:3] * w1[2:3, :]
          + b1_ref[...])                                  # (T, 100)
    h1 = jax.nn.sigmoid(h1)                               # EUP exp/reciprocal

    # ---- Layer 2: Linear(100, 10) -- K=100, keep on the MXU with f32 accum.
    h2 = jnp.dot(h1, w2_ref[...], preferred_element_type=jnp.float32) + b2_ref[...]
    h2 = jax.nn.sigmoid(h2)                               # (T, 10)

    # ---- Layer 3: Linear(10, 1) -- K=10, N=1: elementwise mul by the
    # broadcast weight row + lane reduce is cheaper than a 1/128-lane MXU pass.
    h3 = jnp.sum(h2 * w3t_ref[...], axis=-1, keepdims=True) + b3_ref[...]  # (T, 1)

    # TODO(synk): output block has lane width 1 (masked vst); output bytes are
    # tiny so we accept it rather than paying an in-kernel transpose.
    o_ref[...] = h3.astype(o_ref.dtype)


def mlp_forward(x, params, *, block_rows=1024):
    """Fused MLP forward. x: (N, 3) f32 -> (N, 1) f32."""
    w1, b1, w2, b2, w3, b3 = params
    w3t = w3.T  # (1, 10): pre-transpose on host so the kernel's lane reduce is direct.

    n = x.shape[0]
    # Batch tile: multiple of 8 sublanes, capped so intermediates (~2 KB/row
    # after lane padding, double-buffered) stay comfortably inside scoped VMEM.
    tile = min(block_rows, max(8, _round_up(n, 8)))
    n_pad = _round_up(n, tile)
    if n_pad != n:
        x = jnp.pad(x, ((0, n_pad - n), (0, 0)))  # padded rows are independent & discarded

    grid = (n_pad // tile,)
    const2d = lambda a: pl.BlockSpec(a.shape, lambda i: (0, 0))  # VMEM-resident params

    out = pl.pallas_call(
        mlp_kernel,
        out_shape=jax.ShapeDtypeStruct((n_pad, 1), jnp.float32),
        grid_spec=pl.GridSpec(
            grid=grid,
            in_specs=[
                pl.BlockSpec((tile, 3), lambda i: (i, 0)),   # x: streamed per tile
                const2d(w1), const2d(b1),
                const2d(w2), const2d(b2),
                const2d(w3t), const2d(b3),
            ],
            out_specs=pl.BlockSpec((tile, 1), lambda i: (i, 0)),
        ),
        compiler_params=pltpu.CompilerParams(
            dimension_semantics=("parallel",),          # batch rows are independent
            vmem_limit_bytes=48 * 1024 * 1024,          # headroom under v7x's 64 MiB
        ),
    )(x, w1, b1, w2, b2, w3t, b3)

    return out[:n]


def init_params(key):
    # PyTorch nn.Linear default init: U(-1/sqrt(fan_in), 1/sqrt(fan_in)).
    def linear(key, fan_in, fan_out):
        kw, kb = jax.random.split(key)
        bound = 1.0 / jnp.sqrt(fan_in)
        # stored as (in, out) == W.T so the kernel computes x @ W + b
        w = jax.random.uniform(kw, (fan_in, fan_out), jnp.float32, -bound, bound)
        b = jax.random.uniform(kb, (1, fan_out), jnp.float32, -bound, bound)
        return w, b

    k1, k2, k3 = jax.random.split(key, 3)
    w1, b1 = linear(k1, 3, 100)
    w2, b2 = linear(k2, 100, 10)
    w3, b3 = linear(k3, 10, 1)
    return (w1, b1, w2, b2, w3, b3)


def reference_forward(x, params):
    w1, b1, w2, b2, w3, b3 = params
    h1 = jax.nn.sigmoid(x @ w1 + b1)
    h2 = jax.nn.sigmoid(h1 @ w2 + b2)
    return h2 @ w3 + b3


if __name__ == "__main__":
    key = jax.random.PRNGKey(0)
    k_params, k_x = jax.random.split(key)

    params = init_params(k_params)
    x = jax.random.normal(k_x, (8, 3), jnp.float32)  # batch=8, in_features=3

    out = mlp_forward(x, params)
    out = jax.block_until_ready(out)

    ref = reference_forward(x, params)
    assert out.shape == (8, 1), f"bad shape {out.shape}"
    assert jnp.allclose(out, ref, atol=1e-5, rtol=1e-5), (
        f"mismatch: max abs err {jnp.max(jnp.abs(out - ref))}"
    )

    # Also exercise the tiled path (batch not a multiple of the tile).
    x_big = jax.random.normal(k_x, (3000, 3), jnp.float32)
    out_big = jax.block_until_ready(mlp_forward(x_big, params))
    ref_big = reference_forward(x_big, params)
    assert out_big.shape == (3000, 1)
    assert jnp.allclose(out_big, ref_big, atol=1e-5, rtol=1e-5), (
        f"tiled mismatch: max abs err {jnp.max(jnp.abs(out_big - ref_big))}"
    )

    print("KERNEL_OK")
</pallas_src>

<mosaic_0001>
module attributes {stable_mosaic.version = 11 : i64} {
  func.func @mlp_kernel(%arg0: i32, %arg1: memref<8x3xf32, #tpu.memory_space<vmem>>, %arg2: memref<3x100xf32, #tpu.memory_space<vmem>>, %arg3: memref<1x100xf32, #tpu.memory_space<vmem>>, %arg4: memref<100x10xf32, #tpu.memory_space<vmem>>, %arg5: memref<1x10xf32, #tpu.memory_space<vmem>>, %arg6: memref<1x10xf32, #tpu.memory_space<vmem>>, %arg7: memref<1x1xf32, #tpu.memory_space<vmem>>, %arg8: memref<8x1xf32, #tpu.memory_space<vmem>>) attributes {dimension_semantics = [#tpu.dimension_semantics<parallel>], iteration_bounds = array<i64: 1>, scalar_prefetch = 0 : i64, scratch_operands = 0 : i64, tpu.core_type = #tpu.core_type<tc>, window_params = [{transform_indices = @transform_0, window_bounds = array<i64: 8, 3>}, {pipeline_mode = #tpu.pipeline_mode<synchronous>, transform_indices = @transform_1, window_bounds = array<i64: 3, 100>}, {pipeline_mode = #tpu.pipeline_mode<synchronous>, transform_indices = @transform_2, window_bounds = array<i64: 1, 100>}, {pipeline_mode = #tpu.pipeline_mode<synchronous>, transform_indices = @transform_3, window_bounds = array<i64: 100, 10>}, {pipeline_mode = #tpu.pipeline_mode<synchronous>, transform_indices = @transform_4, window_bounds = array<i64: 1, 10>}, {pipeline_mode = #tpu.pipeline_mode<synchronous>, transform_indices = @transform_5, window_bounds = array<i64: 1, 10>}, {pipeline_mode = #tpu.pipeline_mode<synchronous>, transform_indices = @transform_6, window_bounds = array<i64: 1, 1>}, {transform_indices = @transform_7, window_bounds = array<i64: 8, 1>}]} {
    %c0 = arith.constant 0 : index
    %c0_0 = arith.constant 0 : index
    %0 = vector.load %arg1[%c0, %c0_0] : memref<8x3xf32, #tpu.memory_space<vmem>>, vector<8x3xf32>
    %c0_1 = arith.constant 0 : index
    %c0_2 = arith.constant 0 : index
    %1 = vector.load %arg2[%c0_1, %c0_2] : memref<3x100xf32, #tpu.memory_space<vmem>>, vector<3x100xf32>
    %2 = vector.extract_strided_slice %0 {offsets = [0, 0], sizes = [8, 1], strides = [1, 1]} : vector<8x3xf32> to vector<8x1xf32>
    %3 = vector.extract_strided_slice %1 {offsets = [0, 0], sizes = [1, 100], strides = [1, 1]} : vector<3x100xf32> to vector<1x100xf32>
    %4 = vector.broadcast %2 : vector<8x1xf32> to vector<8x100xf32>
    %5 = vector.broadcast %3 : vector<1x100xf32> to vector<8x100xf32>
    %6 = arith.mulf %4, %5 : vector<8x100xf32>
    %7 = vector.extract_strided_slice %0 {offsets = [0, 1], sizes = [8, 1], strides = [1, 1]} : vector<8x3xf32> to vector<8x1xf32>
    %8 = vector.extract_strided_slice %1 {offsets = [1, 0], sizes = [1, 100], strides = [1, 1]} : vector<3x100xf32> to vector<1x100xf32>
    %9 = vector.broadcast %7 : vector<8x1xf32> to vector<8x100xf32>
    %10 = vector.broadcast %8 : vector<1x100xf32> to vector<8x100xf32>
    %11 = arith.mulf %9, %10 : vector<8x100xf32>
    %12 = arith.addf %6, %11 : vector<8x100xf32>
    %13 = vector.extract_strided_slice %0 {offsets = [0, 2], sizes = [8, 1], strides = [1, 1]} : vector<8x3xf32> to vector<8x1xf32>
    %14 = vector.extract_strided_slice %1 {offsets = [2, 0], sizes = [1, 100], strides = [1, 1]} : vector<3x100xf32> to vector<1x100xf32>
    %15 = vector.broadcast %13 : vector<8x1xf32> to vector<8x100xf32>
    %16 = vector.broadcast %14 : vector<1x100xf32> to vector<8x100xf32>
    %17 = arith.mulf %15, %16 : vector<8x100xf32>
    %18 = arith.addf %12, %17 : vector<8x100xf32>
    %c0_3 = arith.constant 0 : index
    %c0_4 = arith.constant 0 : index
    %19 = vector.load %arg3[%c0_3, %c0_4] : memref<1x100xf32, #tpu.memory_space<vmem>>, vector<1x100xf32>
    %20 = vector.broadcast %19 : vector<1x100xf32> to vector<8x100xf32>
    %21 = arith.addf %18, %20 : vector<8x100xf32>
    %22 = arith.negf %21 : vector<8x100xf32>
    %23 = math.exp %22 : vector<8x100xf32>
    %cst = arith.constant 1.000000e+00 : f32
    %24 = vector.broadcast %cst : f32 to vector<8x100xf32>
    %25 = arith.addf %24, %23 : vector<8x100xf32>
    %26 = arith.divf %24, %25 : vector<8x100xf32>
    %c0_5 = arith.constant 0 : index
    %c0_6 = arith.constant 0 : index
    %27 = vector.load %arg4[%c0_5, %c0_6] : memref<100x10xf32, #tpu.memory_space<vmem>>, vector<100x10xf32>
    %cst_7 = arith.constant dense<0.000000e+00> : vector<8x10xf32>
    %28 = tpu.matmul %26, %27, %cst_7 {dimension_numbers = #tpu.dot_dimension_numbers<[1], [0], [0], [1], [0, 0, 1, 1], [], []>} : vector<8x100xf32>, vector<100x10xf32>, vector<8x10xf32> -> vector<8x10xf32>
    %c0_8 = arith.constant 0 : index
    %c0_9 = arith.constant 0 : index
    %29 = vector.load %arg5[%c0_8, %c0_9] : memref<1x10xf32, #tpu.memory_space<vmem>>, vector<1x10xf32>
    %30 = vector.broadcast %29 : vector<1x10xf32> to vector<8x10xf32>
    %31 = arith.addf %28, %30 : vector<8x10xf32>
    %32 = arith.negf %31 : vector<8x10xf32>
    %33 = math.exp %32 : vector<8x10xf32>
    %cst_10 = arith.constant 1.000000e+00 : f32
    %34 = vector.broadcast %cst_10 : f32 to vector<8x10xf32>
    %35 = arith.addf %34, %33 : vector<8x10xf32>
    %36 = arith.divf %34, %35 : vector<8x10xf32>
    %c0_11 = arith.constant 0 : index
    %c0_12 = arith.constant 0 : index
    %37 = vector.load %arg6[%c0_11, %c0_12] : memref<1x10xf32, #tpu.memory_space<vmem>>, vector<1x10xf32>
    %38 = vector.broadcast %37 : vector<1x10xf32> to vector<8x10xf32>
    %39 = arith.mulf %36, %38 : vector<8x10xf32>
    %cst_13 = arith.constant dense<0.000000e+00> : vector<8xf32>
    %40 = vector.multi_reduction <add>, %39, %cst_13 [1] : vector<8x10xf32> to vector<8xf32>
    %41 = vector.shape_cast %40 : vector<8xf32> to vector<8x1xf32>
    %c0_14 = arith.constant 0 : index
    %c0_15 = arith.constant 0 : index
    %42 = vector.load %arg7[%c0_14, %c0_15] : memref<1x1xf32, #tpu.memory_space<vmem>>, vector<1x1xf32>
    %43 = vector.broadcast %42 : vector<1x1xf32> to vector<8x1xf32>
    %44 = arith.addf %41, %43 : vector<8x1xf32>
    %c0_16 = arith.constant 0 : index
    %c0_17 = arith.constant 0 : index
    %45 = vector.load %arg8[%c0_16, %c0_17] : memref<8x1xf32, #tpu.memory_space<vmem>>, vector<8x1xf32>
    tpu.vector_store %arg8[%c0_16, %c0_17], %44 {strides = array<i32>} : memref<8x1xf32, #tpu.memory_space<vmem>>, vector<8x1xf32>,
    return
  }
  func.func @transform_0(%arg0: i32) -> (i32, i32) {
    %c0_i32 = arith.constant 0 : i32
    %c0_i32_0 = arith.constant 0 : i32
    return %arg0, %c0_i32 : i32, i32
  }
  func.func @transform_1(%arg0: i32) -> (i32, i32) {
    %c0_i32 = arith.constant 0 : i32
    %c0_i32_0 = arith.constant 0 : i32
    %c0_i32_1 = arith.constant 0 : i32
    return %c0_i32, %c0_i32_0 : i32, i32
  }
  func.func @transform_2(%arg0: i32) -> (i32, i32) {
    %c0_i32 = arith.constant 0 : i32
    %c0_i32_0 = arith.constant 0 : i32
    %c0_i32_1 = arith.constant 0 : i32
    return %c0_i32, %c0_i32_0 : i32, i32
  }
  func.func @transform_3(%arg0: i32) -> (i32, i32) {
    %c0_i32 = arith.constant 0 : i32
    %c0_i32_0 = arith.constant 0 : i32
    %c0_i32_1 = arith.constant 0 : i32
    return %c0_i32, %c0_i32_0 : i32, i32
  }
  func.func @transform_4(%arg0: i32) -> (i32, i32) {
    %c0_i32 = arith.constant 0 : i32
    %c0_i32_0 = arith.constant 0 : i32
    %c0_i32_1 = arith.constant 0 : i32
    return %c0_i32, %c0_i32_0 : i32, i32
  }
  func.func @transform_5(%arg0: i32) -> (i32, i32) {
    %c0_i32 = arith.constant 0 : i32
    %c0_i32_0 = arith.constant 0 : i32
    %c0_i32_1 = arith.constant 0 : i32
    return %c0_i32, %c0_i32_0 : i32, i32
  }
  func.func @transform_6(%arg0: i32) -> (i32, i32) {
    %c0_i32 = arith.constant 0 : i32
    %c0_i32_0 = arith.constant 0 : i32
    %c0_i32_1 = arith.constant 0 : i32
    return %c0_i32, %c0_i32_0 : i32, i32
  }
  func.func @transform_7(%arg0: i32) -> (i32, i32) {
    %c0_i32 = arith.constant 0 : i32
    %c0_i32_0 = arith.constant 0 : i32
    return %arg0, %c0_i32 : i32, i32
  }
}

</mosaic_0001>

<bundles_post_ra>
// kernel: tpu_custom_call.1
= control target key start
LH: loop header
LB: loop body
LE: loop exit
PB: predicated region body
PF: predicated region fallthrough
CT: control target
= control target key end

     0   :  { %v291_v0 = vmov 0   ;;  %v292_v2 = vmov 2   ;;  %v293_v3 = vmov 1   ;;  %v294_v7 = vmov 0.0|0.0   ;;  %s397_s0 = inlined_call_operand.vmem [shape: f32[8,3], index: 0, kind: input, shape index: {}]   ;;  %s398_s3 = inlined_call_operand.vmem [shape: f32[100,10], index: 3, kind: input, shape index: {}]   ;;  %s399_s1 = inlined_call_operand.vmem [shape: f32[3,100], index: 1, kind: input, shape index: {}]   ;;  %s400_s2 = inlined_call_operand.vmem [shape: f32[1,100], index: 2, kind: input, shape index: {}]   ;;  %s401_s6 = inlined_call_operand.<no memory space> [shape: f32[1,1], index: 6, kind: input, shape index: {}]   ;;  %s402_s4 = inlined_call_operand.vmem [shape: f32[1,10], index: 4, kind: input, shape index: {}]   ;;  %s403_s5 = inlined_call_operand.vmem [shape: f32[1,10], index: 5, kind: input, shape index: {}]   ;;  %s404_s7 = inlined_call_operand.vmem [shape: f32[8,1], index: 7, kind: output, shape index: {}]  }
   0x1   :  { %279 = vset.pattern.permute.xlu0 %v291_v0  ;;  %v28_v1 = vld [vmem:[%s397_s0] sm:$0xff]  ;;  %281 = vset.pattern.permute.xlu1 %v292_v2  ;;  %v75_v5 = vld [vmem:[%s398_s3 + $0x8] sm:$0xff]  ;;  %v76_v8 = vld [vmem:[%s398_s3 + $0x10] sm:$0xff]  ;;  %vm295_vm0 = vmmov 0   ;;  %v296_v23 = vmov 0.0   ;;  %vm98_vm1 = vcmask 1043456   ;;  %v35_v25 = vlaneseq }
   0x2   :  { %32 = vperm.xlu0 %279, %v28_v1   ;;  %51 = vperm.xlu1 %281, %v28_v1   ;;  %v74_v4 = vld [vmem:[%s398_s3] sm:$0xff]  ;;  %v77_v9 = vld [vmem:[%s398_s3 + $0x18] sm:$0xff]  ;;  %v79_v12 = vld [vmem:[%s398_s3 + $0x28] sm:$0xff]  ;;  %vm94_vm2 = vcmask 818176   ;;  %v12_v48 = vstv %s401_s6  ;;  %vm186_vm3 = vcmask 80896   ;;  %vm198_vm4 = vcmask 7168  }
   0x3   :  { %v256_v6 = vpack.c.bf16 %v75_v5, %v74_v4  ;;  %255 = vmatprep.subr.bf16.mxu0 %v294_v7  ;;  %v259_v10 = vpack.c.bf16 %v77_v9, %v76_v8  ;;  %v78_v11 = vld [vmem:[%s398_s3 + $0x20] sm:$0xff]  ;;  %v80_v14 = vld [vmem:[%s398_s3 + $0x30] sm:$0xff]  ;;  %v81_v15 = vld [vmem:[%s398_s3 + $0x38] sm:$0xff]  ;;  %252 = vmatprep.mubr.msk.f32.mxu0 %vm295_vm0, %v296_v23  ;;  %v36_v26 = vshrl.u32 %v35_v25, 7  ;;  %13 = vst [vmem:[#allocation2] sm:$0x1] %v12_v48 }
   0x4   :  { %v262_v13 = vpack.c.bf16 %v79_v12, %v78_v11  ;;  %v265_v16 = vpack.c.bf16 %v81_v15, %v80_v14  ;;  %v82_v17 = vld [vmem:[%s398_s3 + $0x40] sm:$0xff]  ;;  %v83_v18 = vld [vmem:[%s398_s3 + $0x48] sm:$0xff]  ;;  %v84_v20 = vld [vmem:[%s398_s3 + $0x50] sm:$0xff] }
   0x5   :  { %257 = vmatpush3.bf16.msra.mxu0 %v256_v6  ;;  %v268_v19 = vpack.c.bf16 %v83_v18, %v82_v17  ;;  %v85_v21 = vld [vmem:[%s398_s3 + $0x58] sm:$0xff]  ;;  %v86_v24 = vld [vmem:[%s398_s3 + $0x60] sm:$0xf]  ;;  %v37_v27 = vsub.s32 0, %v36_v26  ;;  %v46_v28 = vsub.s32 1, %v36_v26  ;;  %v56_v29 = vsub.s32 2, %v36_v26 }
   0x6   :  { %280 = vset.pattern.permute.xlu0 %v293_v3  ;;  %258 = vmatprep.subr.bf16.mxu0 %v294_v7  ;;  %v271_v22 = vpack.c.bf16 %v85_v21, %v84_v20  ;;  %v29_v30 = vld [vmem:[%s399_s1] sm:$0x7] }
   0x7   :  { %41 = vperm.xlu0 %280, %v28_v1   ;;  %v38_v32 = vrot.slane %v29_v30, %v37_v27  ;;  %v47_v33 = vrot.slane %v29_v30, %v46_v28  ;;  %v57_v34 = vrot.slane %v29_v30, %v56_v29  ;;  %v204_v41 = vld [vmem:[%s400_s2] ss:$0 sm:$0xff] }
   0x8   :  { %v206_v49 = vld [vmem:[%s402_s4] ss:$0 sm:$0xff] }
   0x9   :  { %260 = vmatpush3.bf16.msra.mxu0 %v259_v10  ;;  %v210_v56 = vld [vmem:[%s403_s5] ss:$0 sm:$0xff] }
   0xa   :  { %261 = vmatprep.subr.bf16.mxu0 %v294_v7  ;;  %v211_v60 = vld [vmem:[#allocation2] ss:$0 sm:$0xff] }
   0xb   :  { %282 = vset.pattern.permute.xlu0 %v292_v2 }
   0xd   :  { %263 = vmatpush3.bf16.msra.mxu0 %v262_v13 }
   0xe   :  { %264 = vmatprep.subr.bf16.mxu0 %v294_v7 }
  0x11   :  { %266 = vmatpush3.bf16.msra.mxu0 %v265_v16 }
  0x12   :  { %267 = vmatprep.subr.bf16.mxu0 %v294_v7 }
  0x15   :  { %269 = vmatpush3.bf16.msra.mxu0 %v268_v19 }
  0x16   :  { %270 = vmatprep.subr.bf16.mxu0 %v294_v7 }
  0x19   :  { %272 = vmatpush3.bf16.msra.mxu0 %v271_v22 }
  0x1a   :  { %250 = vmatprep.subr.mxu0 %v296_v23 }
  0x1d   :  { %251 = vmatpush3.msk.msra.mxu0 %vm98_vm1, %v86_v24 }
  0x81   :  { %v33_v31 = vpop.permute.xlu0 %32  ;;  %v52_v35 = vpop.permute.xlu1 %51 }
  0x82   :  { %v39_v37 = vmul.f32 %v38_v32, %v33_v31  ;;  %v58_v39 = vmul.f32 %v57_v34, %v52_v35 }
  0x86   :  { %v42_v36 = vpop.permute.xlu0 %41 }
  0x87   :  { %v48_v38 = vmul.f32 %v47_v33, %v42_v36 }
  0x89   :  { %v49_v40 = vadd.f32 %v48_v38, %v39_v37 }
  0x8b   :  { %v59_v42 = vadd.f32 %v58_v39, %v49_v40 }
  0x8d   :  { %v67_v43 = vadd.f32 %v204_v41, %v59_v42 }
  0x8f   :  { %v205_v44 = vmul.f32 -1.442695, %v67_v43 }
  0x91   :  { %283 = vpow2.f32 %v205_v44 }
  0x9b   :  { %v284_v45 = vpop.eup %283 }
  0x9c   :  { %v71_v46 = vadd.f32 1.0, %v284_v45 }
  0x9e   :  { %285 = vrcp.f32 %v71_v46 }
  0xa8   :  { %v286_v47 = vpop.eup %285 }
  0xa9   :  { %253 = vmatmul.mubr.msk.f32.vlgmr.msra.gmra.mrb[0].mxu0 %vm94_vm2, %v286_v47 }
 0x17c   :  { %v168_v50 = vpop.f32.mrb[0].mxu0 }
 0x17d   :  { %v169_v51 = vadd.f32 %v206_v49, %v168_v50  ;;  %v254_v52 = vpop.f32.mrb[1].mxu0 }
 0x17f   :  { %v209_v53 = vmul.f32 -1.442695, %v169_v51 }
 0x181   :  { %287 = vpow2.f32 %v209_v53 }
 0x18b   :  { %v288_v54 = vpop.eup %287 }
 0x18c   :  { %v175_v55 = vadd.f32 1.0, %v288_v54 }
 0x18e   :  { %289 = vrcp.f32 %v175_v55 }
 0x198   :  { %v290_v57 = vpop.eup %289 }
 0x199   :  { %v185_v58 = vmul.f32 %v290_v57, %v210_v56 }
 0x19b   :  { %v187_v59 = vsel %vm186_vm3, %v185_v58, 0.0 }
 0x19c   :  { %188 = vadd.xlane.f32.xlu1 %v187_v59 }
 0x229   :  { %v189_v61 = vpop.xlane.xlu1 %188 }
 0x22a   :  { %v197_v62 = vadd.f32 %v211_v60, %v189_v61 }
 0x22c   :  { %199 = vst.msk [vmem:[%s404_s7] sm:$0xff] %vm198_vm4, %v197_v62 }

</bundles_post_ra>
